<compile_context>
chip_gen: v7x
topology: tpu7x:2x2x1
jax: 0.10.0
libtpu: 0.0.40
codegen_flags: <defaults>
</compile_context>

<pallas_src>
import jax
import jax.numpy as jnp
from jax.experimental import pallas as pl
from jax.experimental.pallas import tpu as pltpu


def _round_up(n, m):
    return ((n + m - 1) // m) * m


def _ppo_kernel(x_ref, w1_ref, b1_ref, w2_ref, b2_ref, wh_ref, bh_ref,
                lmask_ref, vsel_ref, out_ref):
    # x tile (TB, in_dim) f32 -> bf16 for the MXU; accumulate in f32.
    x = x_ref[...].astype(jnp.bfloat16)

    # shared MLP: Linear -> ReLU -> Linear -> ReLU (bf16 MXU, f32 epilogue)
    h1 = jnp.dot(x, w1_ref[...], preferred_element_type=jnp.float32) + b1_ref[...]
    h1 = jnp.maximum(h1, 0.0).astype(jnp.bfloat16)

    h2 = jnp.dot(h1, w2_ref[...], preferred_element_type=jnp.float32) + b2_ref[...]
    h2 = jnp.maximum(h2, 0.0).astype(jnp.bfloat16)

    # fused actor+critic head: columns [0, out_dim) are actor logits, column
    # `out_dim` is the critic value, remaining columns are zero padding.
    head = jnp.dot(h2, wh_ref[...], preferred_element_type=jnp.float32) + bh_ref[...]

    # additive mask row: 0 over actor columns, -inf over value/pad columns.
    logits = head + lmask_ref[...]
    m = jnp.max(logits, axis=-1, keepdims=True)
    e = jnp.exp(logits - m)                       # exactly 0 outside actor cols
    s = jnp.sum(e, axis=-1, keepdims=True)        # (TB, 1)
    probs = e * (1.0 / s)                         # per-row exact f32 reciprocal

    # probs is exactly 0 in the value column (its mask is -inf), so a single
    # one-hot add places the raw critic value there.  Lane-dense (TB,128) store.
    out_ref[...] = probs + vsel_ref[...] * head


def prepare_ppo_params(params):
    """One-time parameter prep (do NOT call per forward step).

    Fuses actor + critic heads into one 128-lane-padded weight/bias, casts the
    MXU-feeding weights to bf16, and precomputes the softmax logit-mask row
    (0 / -inf) and the critic one-hot selector row.
    """
    w1, b1, w2, b2, wa, ba, wc, bc = params
    out_dim = wa.shape[1]
    head_pad = _round_up(out_dim + 1, 128)
    pad = head_pad - (out_dim + 1)

    wh = jnp.pad(jnp.concatenate([wa, wc], axis=1), ((0, 0), (0, pad)))
    bh = jnp.pad(jnp.concatenate([ba, bc], axis=1), ((0, 0), (0, pad)))

    col = jnp.arange(head_pad)[None, :]
    logit_mask = jnp.where(col < out_dim, 0.0, -jnp.inf).astype(jnp.float32)
    value_sel = (col == out_dim).astype(jnp.float32)

    return (
        w1.astype(jnp.bfloat16), b1.astype(jnp.float32),
        w2.astype(jnp.bfloat16), b2.astype(jnp.float32),
        wh.astype(jnp.bfloat16), bh.astype(jnp.float32),
        logit_mask, value_sel,
    )


def _pick_batch_tile(B):
    # Small batches: one padded tile.  Larger batches: tiles of up to 2048
    # rows, multiples of 128, and >= 2 grid steps so both v7x TensorCores get
    # work under the "parallel" batch axis.
    if B < 256:
        return _round_up(B, 8)
    return min(2048, _round_up((B + 1) // 2, 128))


def _resident(a):
    # Same block every grid step -> VMEM-resident; single-buffered since the
    # block index never changes (saves a redundant pipeline buffer).
    shape = a.shape
    return pl.BlockSpec(shape, lambda i: (0,) * len(shape),
                        pipeline_mode=pl.Buffered(1))


def ppo_forward(x, prepped, *, out_dim):
    """Fused PPO forward. x: (B, input_dim) f32. Returns (probs, value)."""
    w1, b1, w2, b2, wh, bh, lmask, vsel = prepped
    B, in_dim = x.shape
    head_pad = wh.shape[1]

    TB = _pick_batch_tile(B)
    Bp = _round_up(B, TB)
    if Bp != B:
        # Padded batch rows run a softmax over bias-only logits (finite -> no
        # NaN); they are sliced off below and never observed.
        x = jnp.pad(x, ((0, Bp - B), (0, 0)))
    grid = (Bp // TB,)

    out = pl.pallas_call(
        _ppo_kernel,
        out_shape=jax.ShapeDtypeStruct((Bp, head_pad), jnp.float32),
        grid=grid,
        in_specs=[
            pl.BlockSpec((TB, in_dim), lambda i: (i, 0)),   # x: tiled over batch
            _resident(w1), _resident(b1),
            _resident(w2), _resident(b2),
            _resident(wh), _resident(bh),
            _resident(lmask), _resident(vsel),
        ],
        out_specs=pl.BlockSpec((TB, head_pad), lambda i: (i, 0)),
        compiler_params=pltpu.CompilerParams(
            dimension_semantics=("parallel",),
            # Raised above v5e's 16 MiB scoped default so TB=2048 f32
            # intermediates fit; stays under v7x's 64 MiB physical VMEM.
            vmem_limit_bytes=48 * 1024 * 1024,
        ),
    )(x, w1, b1, w2, b2, wh, bh, lmask, vsel)

    probs = out[:B, :out_dim]
    value = out[:B, out_dim:out_dim + 1]
    return probs, value


def init_ppo_params(key, input_dim, output_dim, hidden=256):
    """Deterministic Kaiming-uniform (relu gain) weights, zero biases."""
    def kaiming_uniform(k, fan_in, fan_out):
        # PyTorch kaiming_uniform_(nonlinearity='relu'): bound = sqrt(2)*sqrt(3/fan_in)
        bound = jnp.sqrt(6.0 / fan_in)
        return jax.random.uniform(k, (fan_in, fan_out), jnp.float32, -bound, bound)

    k1, k2, k3, k4 = jax.random.split(key, 4)
    w1 = kaiming_uniform(k1, input_dim, hidden)
    b1 = jnp.zeros((1, hidden), jnp.float32)
    w2 = kaiming_uniform(k2, hidden, hidden)
    b2 = jnp.zeros((1, hidden), jnp.float32)
    wa = kaiming_uniform(k3, hidden, output_dim)
    ba = jnp.zeros((1, output_dim), jnp.float32)
    wc = kaiming_uniform(k4, hidden, 1)
    bc = jnp.zeros((1, 1), jnp.float32)
    return (w1, b1, w2, b2, wa, ba, wc, bc)


def ppo_reference(x, params):
    """Pure-JAX f32 reference of the PyTorch module's forward."""
    w1, b1, w2, b2, wa, ba, wc, bc = params
    h = jnp.maximum(x @ w1 + b1, 0.0)
    h = jnp.maximum(h @ w2 + b2, 0.0)
    probs = jax.nn.softmax(h @ wa + ba, axis=-1)
    value = h @ wc + bc
    return probs, value


if __name__ == "__main__":
    input_dim = 16
    output_dim = 8
    batch = 2

    key = jax.random.PRNGKey(0)
    kp, kx = jax.random.split(key)
    params = init_ppo_params(kp, input_dim, output_dim)
    prepped = prepare_ppo_params(params)            # one-time weight prep (hoisted)
    x = jax.random.normal(kx, (batch, input_dim), jnp.float32)

    fwd = jax.jit(ppo_forward, static_argnames=("out_dim",))
    probs, value = fwd(x, prepped, out_dim=output_dim)
    jax.block_until_ready((probs, value))

    # sanity: shapes match the PyTorch module, probs are a valid distribution
    assert probs.shape == (batch, output_dim)
    assert value.shape == (batch, 1)
    assert jnp.allclose(jnp.sum(probs, axis=-1), 1.0, atol=1e-5)
    assert jnp.all(probs >= 0.0)

    # loose parity vs f32 reference (MXU feeds are bf16 by design)
    p_ref, v_ref = ppo_reference(x, params)
    assert jnp.allclose(probs, p_ref, atol=5e-2, rtol=5e-2)
    assert jnp.allclose(value, v_ref, atol=5e-2, rtol=5e-2)

    print("KERNEL_OK")
</pallas_src>

<mosaic_0001>
module attributes {stable_mosaic.version = 11 : i64} {
  func.func @_ppo_kernel(%arg0: i32, %arg1: memref<8x16xf32, #tpu.memory_space<vmem>>, %arg2: memref<16x256xbf16, #tpu.memory_space<vmem>>, %arg3: memref<1x256xf32, #tpu.memory_space<vmem>>, %arg4: memref<256x256xbf16, #tpu.memory_space<vmem>>, %arg5: memref<1x256xf32, #tpu.memory_space<vmem>>, %arg6: memref<256x128xbf16, #tpu.memory_space<vmem>>, %arg7: memref<1x128xf32, #tpu.memory_space<vmem>>, %arg8: memref<1x128xf32, #tpu.memory_space<vmem>>, %arg9: memref<1x128xf32, #tpu.memory_space<vmem>>, %arg10: memref<8x128xf32, #tpu.memory_space<vmem>>) attributes {dimension_semantics = [#tpu.dimension_semantics<parallel>], iteration_bounds = array<i64: 1>, scalar_prefetch = 0 : i64, scratch_operands = 0 : i64, tpu.core_type = #tpu.core_type<tc>, window_params = [{transform_indices = @transform_0, window_bounds = array<i64: 8, 16>}, {pipeline_mode = #tpu.pipeline_mode<synchronous>, transform_indices = @transform_1, window_bounds = array<i64: 16, 256>}, {pipeline_mode = #tpu.pipeline_mode<synchronous>, transform_indices = @transform_2, window_bounds = array<i64: 1, 256>}, {pipeline_mode = #tpu.pipeline_mode<synchronous>, transform_indices = @transform_3, window_bounds = array<i64: 256, 256>}, {pipeline_mode = #tpu.pipeline_mode<synchronous>, transform_indices = @transform_4, window_bounds = array<i64: 1, 256>}, {pipeline_mode = #tpu.pipeline_mode<synchronous>, transform_indices = @transform_5, window_bounds = array<i64: 256, 128>}, {pipeline_mode = #tpu.pipeline_mode<synchronous>, transform_indices = @transform_6, window_bounds = array<i64: 1, 128>}, {pipeline_mode = #tpu.pipeline_mode<synchronous>, transform_indices = @transform_7, window_bounds = array<i64: 1, 128>}, {pipeline_mode = #tpu.pipeline_mode<synchronous>, transform_indices = @transform_8, window_bounds = array<i64: 1, 128>}, {transform_indices = @transform_9, window_bounds = array<i64: 8, 128>}]} {
    %c0 = arith.constant 0 : index
    %c0_0 = arith.constant 0 : index
    %0 = vector.load %arg1[%c0, %c0_0] : memref<8x16xf32, #tpu.memory_space<vmem>>, vector<8x16xf32>
    %1 = arith.truncf %0 : vector<8x16xf32> to vector<8x16xbf16>
    %c0_1 = arith.constant 0 : index
    %c0_2 = arith.constant 0 : index
    %2 = vector.load %arg2[%c0_1, %c0_2] : memref<16x256xbf16, #tpu.memory_space<vmem>>, vector<16x256xbf16>
    %cst = arith.constant dense<0.000000e+00> : vector<8x256xf32>
    %3 = tpu.matmul %1, %2, %cst {dimension_numbers = #tpu.dot_dimension_numbers<[1], [0], [0], [1], [0, 0, 1, 1], [], []>} : vector<8x16xbf16>, vector<16x256xbf16>, vector<8x256xf32> -> vector<8x256xf32>
    %c0_3 = arith.constant 0 : index
    %c0_4 = arith.constant 0 : index
    %4 = vector.load %arg3[%c0_3, %c0_4] : memref<1x256xf32, #tpu.memory_space<vmem>>, vector<1x256xf32>
    %5 = vector.broadcast %4 : vector<1x256xf32> to vector<8x256xf32>
    %6 = arith.addf %3, %5 : vector<8x256xf32>
    %cst_5 = arith.constant 0.000000e+00 : f32
    %7 = vector.broadcast %cst_5 : f32 to vector<8x256xf32>
    %8 = arith.maximumf %6, %7 : vector<8x256xf32>
    %9 = arith.truncf %8 : vector<8x256xf32> to vector<8x256xbf16>
    %c0_6 = arith.constant 0 : index
    %c0_7 = arith.constant 0 : index
    %10 = vector.load %arg4[%c0_6, %c0_7] : memref<256x256xbf16, #tpu.memory_space<vmem>>, vector<256x256xbf16>
    %cst_8 = arith.constant dense<0.000000e+00> : vector<8x256xf32>
    %11 = tpu.matmul %9, %10, %cst_8 {dimension_numbers = #tpu.dot_dimension_numbers<[1], [0], [0], [1], [0, 0, 1, 1], [], []>} : vector<8x256xbf16>, vector<256x256xbf16>, vector<8x256xf32> -> vector<8x256xf32>
    %c0_9 = arith.constant 0 : index
    %c0_10 = arith.constant 0 : index
    %12 = vector.load %arg5[%c0_9, %c0_10] : memref<1x256xf32, #tpu.memory_space<vmem>>, vector<1x256xf32>
    %13 = vector.broadcast %12 : vector<1x256xf32> to vector<8x256xf32>
    %14 = arith.addf %11, %13 : vector<8x256xf32>
    %cst_11 = arith.constant 0.000000e+00 : f32
    %15 = vector.broadcast %cst_11 : f32 to vector<8x256xf32>
    %16 = arith.maximumf %14, %15 : vector<8x256xf32>
    %17 = arith.truncf %16 : vector<8x256xf32> to vector<8x256xbf16>
    %c0_12 = arith.constant 0 : index
    %c0_13 = arith.constant 0 : index
    %18 = vector.load %arg6[%c0_12, %c0_13] : memref<256x128xbf16, #tpu.memory_space<vmem>>, vector<256x128xbf16>
    %cst_14 = arith.constant dense<0.000000e+00> : vector<8x128xf32>
    %19 = tpu.matmul %17, %18, %cst_14 {dimension_numbers = #tpu.dot_dimension_numbers<[1], [0], [0], [1], [0, 0, 1, 1], [], []>} : vector<8x256xbf16>, vector<256x128xbf16>, vector<8x128xf32> -> vector<8x128xf32>
    %c0_15 = arith.constant 0 : index
    %c0_16 = arith.constant 0 : index
    %20 = vector.load %arg7[%c0_15, %c0_16] : memref<1x128xf32, #tpu.memory_space<vmem>>, vector<1x128xf32>
    %21 = vector.broadcast %20 : vector<1x128xf32> to vector<8x128xf32>
    %22 = arith.addf %19, %21 : vector<8x128xf32>
    %c0_17 = arith.constant 0 : index
    %c0_18 = arith.constant 0 : index
    %23 = vector.load %arg8[%c0_17, %c0_18] : memref<1x128xf32, #tpu.memory_space<vmem>>, vector<1x128xf32>
    %24 = vector.broadcast %23 : vector<1x128xf32> to vector<8x128xf32>
    %25 = arith.addf %22, %24 : vector<8x128xf32>
    %cst_19 = arith.constant dense<0xFF800000> : vector<8xf32>
    %26 = vector.multi_reduction <maximumf>, %25, %cst_19 [1] : vector<8x128xf32> to vector<8xf32>
    %27 = vector.shape_cast %26 : vector<8xf32> to vector<8x1xf32>
    %28 = vector.broadcast %27 : vector<8x1xf32> to vector<8x128xf32>
    %29 = arith.subf %25, %28 : vector<8x128xf32>
    %30 = math.exp %29 : vector<8x128xf32>
    %cst_20 = arith.constant dense<0.000000e+00> : vector<8xf32>
    %31 = vector.multi_reduction <add>, %30, %cst_20 [1] : vector<8x128xf32> to vector<8xf32>
    %32 = vector.shape_cast %31 : vector<8xf32> to vector<8x1xf32>
    %cst_21 = arith.constant 1.000000e+00 : f32
    %33 = vector.broadcast %cst_21 : f32 to vector<8x1xf32>
    %34 = arith.divf %33, %32 : vector<8x1xf32>
    %35 = vector.broadcast %34 : vector<8x1xf32> to vector<8x128xf32>
    %36 = arith.mulf %30, %35 : vector<8x128xf32>
    %c0_22 = arith.constant 0 : index
    %c0_23 = arith.constant 0 : index
    %37 = vector.load %arg9[%c0_22, %c0_23] : memref<1x128xf32, #tpu.memory_space<vmem>>, vector<1x128xf32>
    %38 = vector.broadcast %37 : vector<1x128xf32> to vector<8x128xf32>
    %39 = arith.mulf %38, %22 : vector<8x128xf32>
    %40 = arith.addf %36, %39 : vector<8x128xf32>
    %c0_24 = arith.constant 0 : index
    %c0_25 = arith.constant 0 : index
    %41 = vector.load %arg10[%c0_24, %c0_25] : memref<8x128xf32, #tpu.memory_space<vmem>>, vector<8x128xf32>
    tpu.vector_store %arg10[%c0_24, %c0_25], %40 {strides = array<i32>} : memref<8x128xf32, #tpu.memory_space<vmem>>, vector<8x128xf32>,
    return
  }
  func.func @transform_0(%arg0: i32) -> (i32, i32) {
    %c0_i32 = arith.constant 0 : i32
    %c0_i32_0 = arith.constant 0 : i32
    return %arg0, %c0_i32 : i32, i32
  }
  func.func @transform_1(%arg0: i32) -> (i32, i32) {
    %c0_i32 = arith.constant 0 : i32
    %c0_i32_0 = arith.constant 0 : i32
    %c0_i32_1 = arith.constant 0 : i32
    return %c0_i32, %c0_i32_0 : i32, i32
  }
  func.func @transform_2(%arg0: i32) -> (i32, i32) {
    %c0_i32 = arith.constant 0 : i32
    %c0_i32_0 = arith.constant 0 : i32
    %c0_i32_1 = arith.constant 0 : i32
    return %c0_i32, %c0_i32_0 : i32, i32
  }
  func.func @transform_3(%arg0: i32) -> (i32, i32) {
    %c0_i32 = arith.constant 0 : i32
    %c0_i32_0 = arith.constant 0 : i32
    %c0_i32_1 = arith.constant 0 : i32
    return %c0_i32, %c0_i32_0 : i32, i32
  }
  func.func @transform_4(%arg0: i32) -> (i32, i32) {
    %c0_i32 = arith.constant 0 : i32
    %c0_i32_0 = arith.constant 0 : i32
    %c0_i32_1 = arith.constant 0 : i32
    return %c0_i32, %c0_i32_0 : i32, i32
  }
  func.func @transform_5(%arg0: i32) -> (i32, i32) {
    %c0_i32 = arith.constant 0 : i32
    %c0_i32_0 = arith.constant 0 : i32
    %c0_i32_1 = arith.constant 0 : i32
    return %c0_i32, %c0_i32_0 : i32, i32
  }
  func.func @transform_6(%arg0: i32) -> (i32, i32) {
    %c0_i32 = arith.constant 0 : i32
    %c0_i32_0 = arith.constant 0 : i32
    %c0_i32_1 = arith.constant 0 : i32
    return %c0_i32, %c0_i32_0 : i32, i32
  }
  func.func @transform_7(%arg0: i32) -> (i32, i32) {
    %c0_i32 = arith.constant 0 : i32
    %c0_i32_0 = arith.constant 0 : i32
    %c0_i32_1 = arith.constant 0 : i32
    return %c0_i32, %c0_i32_0 : i32, i32
  }
  func.func @transform_8(%arg0: i32) -> (i32, i32) {
    %c0_i32 = arith.constant 0 : i32
    %c0_i32_0 = arith.constant 0 : i32
    %c0_i32_1 = arith.constant 0 : i32
    return %c0_i32, %c0_i32_0 : i32, i32
  }
  func.func @transform_9(%arg0: i32) -> (i32, i32) {
    %c0_i32 = arith.constant 0 : i32
    %c0_i32_0 = arith.constant 0 : i32
    return %arg0, %c0_i32 : i32, i32
  }
}

</mosaic_0001>

<bundles_post_ra>
// kernel: ppo_forward.1
= control target key start
LH: loop header
LB: loop body
LE: loop exit
PB: predicated region body
PF: predicated region fallthrough
CT: control target
= control target key end

     0   :  { %14 = vsyncpa [#allocation3], 0  ;;  %s954_s0 = inlined_call_operand.vmem [shape: f32[8,16], index: 0, kind: input, shape index: {}]   ;;  %s955_s1 = inlined_call_operand.hbm [shape: bf16[16,256], index: 1, kind: input, shape index: {}]   ;;  %s956_s2 = inlined_call_operand.vmem [shape: f32[1,256], index: 2, kind: input, shape index: {}]   ;;  %s957_s3 = inlined_call_operand.hbm [shape: bf16[256,256], index: 3, kind: input, shape index: {}]   ;;  %s958_s4 = inlined_call_operand.vmem [shape: f32[1,256], index: 4, kind: input, shape index: {}]   ;;  %s959_s5 = inlined_call_operand.hbm [shape: bf16[256,128], index: 5, kind: input, shape index: {}]   ;;  %s960_s6 = inlined_call_operand.vmem [shape: f32[1,128], index: 6, kind: input, shape index: {}]   ;;  %s961_s7 = inlined_call_operand.vmem [shape: f32[1,128], index: 7, kind: input, shape index: {}]   ;;  %s962_s8 = inlined_call_operand.vmem [shape: f32[1,128], index: 8, kind: input, shape index: {}]   ;;  %s963_s9 = inlined_call_operand.vmem [shape: f32[8,128], index: 9, kind: output, shape index: {}]  }
   0x1   :  { %15 = vsyncpa [#allocation5], 0  ;;  %s832_s30 = smov [#allocation4]   ;;  %s833_s11 = smov [#allocation2]  }
   0x2   :  { %s37_s10 = sshll.u32 %s832_s30, 4  ;;  %s23_s12 = sshll.u32 %s833_s11, 4  ;;  %s38_s10 = int_to_ptr.vmem [resolvable:$true] %s37_s10  ;;  %s890_s12 = int_to_ptr.vmem [resolvable:$true] %s23_s12 }
   0x3   :  { %s762_s15 = scalar_lea.hbm %s957_s3, 4096 }
   0x4   :  { %p763_p0 = scmp.ne.s32.totalorder %s957_s3, %s762_s15  ;;  %p766_p1 = scmp.lt.u32.totalorder %s762_s15, %s957_s3 }
   0x6   :  { %p768_p2 = pnand %p766_p1, %p763_p0 }
   0x8   :  { %771 = shalt.err (!%p768_p2)
}
   0x9   :  { %s772_s20 = scalar_lea.vmem %s38_s10, 4096  ;;  %p777_p4 = scmp.lt.s32.totalorder %s38_s10, %s38_s10 }
   0xa   :  { %p773_p3 = scmp.ne.s32.totalorder %s38_s10, %s772_s20  ;;  %p778_p5 = scmp.lt.s32.totalorder %s772_s20, %s772_s20 }
   0xc   :  { %p779_p6 = por %p778_p5, %p777_p4 }
   0xe   :  { %p780_p7 = pnand %p779_p6, %p773_p3 }
  0x10   :  { %783 = shalt.err (!%p780_p7)
}
  0x11   :  { %s834_s21 = smov 128   ;;  %s835_s22 = smov 8  }
  0x12   :  { %43 = dma.hbm_to_vmem [thread:$0]  %s957_s3, 4096, %s38_s10, [#allocation5], %s834_s21, %s834_s21, %s835_s22  }
  0x13   :  { %s784_s27 = scalar_lea.hbm %s955_s1, 256 }
  0x14   :  { %p785_p8 = scmp.ne.s32.totalorder %s955_s1, %s784_s27  ;;  %p788_p9 = scmp.lt.u32.totalorder %s784_s27, %s955_s1 }
  0x16   :  { %p790_p10 = pnand %p788_p9, %p785_p8 }
  0x18   :  { %793 = shalt.err (!%p790_p10)
}
  0x19   :  { %s794_s13 = scalar_lea.vmem %s890_s12, 256  ;;  %p799_p12 = scmp.lt.s32.totalorder %s890_s12, %s890_s12 }
  0x1a   :  { %p795_p11 = scmp.ne.s32.totalorder %s890_s12, %s794_s13  ;;  %p800_p13 = scmp.lt.s32.totalorder %s794_s13, %s794_s13 }
  0x1c   :  { %p801_p0 = por %p800_p13, %p799_p12 }
  0x1e   :  { %p802_p1 = pnand %p801_p0, %p795_p11 }
  0x20   :  { %805 = shalt.err (!%p802_p1)
}
  0x21   :  { %29 = dma.hbm_to_vmem [thread:$0]  %s955_s1, 256, %s890_s12, [#allocation3], %s834_s21, %s834_s21, %s835_s22  }
  0x22   :  { %s836_s14 = smov [#allocation6]   ;;  %s806_s18 = scalar_lea.hbm %s959_s5, 2048 }
  0x23   :  { %s51_s15 = sshll.u32 %s836_s14, 4  ;;  %p807_p2 = scmp.ne.s32.totalorder %s959_s5, %s806_s18  ;;  %s52_s15 = int_to_ptr.vmem [resolvable:$true] %s51_s15 }
  0x24   :  { %p810_p3 = scmp.lt.u32.totalorder %s806_s18, %s959_s5 }
  0x26   :  { %p812_p4 = pnand %p810_p3, %p807_p2 }
  0x28   :  { %815 = shalt.err (!%p812_p4)
}
  0x29   :  { %s816_s25 = scalar_lea.vmem %s52_s15, 2048  ;;  %p821_p6 = scmp.lt.s32.totalorder %s52_s15, %s52_s15 }
  0x2a   :  { %p817_p5 = scmp.ne.s32.totalorder %s52_s15, %s816_s25  ;;  %p822_p7 = scmp.lt.s32.totalorder %s816_s25, %s816_s25 }
  0x2c   :  { %p823_p8 = por %p822_p7, %p821_p6 }
  0x2e   :  { %p824_p9 = pnand %p823_p8, %p817_p5 }
  0x30   :  { %827 = shalt.err (!%p824_p9)
}
  0x31   :  { %s837_s1 = smov 64   ;;  %s838_s12 = smov 4  }
  0x32   :  { %57 = dma.hbm_to_vmem [thread:$0]  %s959_s5, 2048, %s52_s15, [#allocation5], %s837_s1, %s837_s1, %s838_s12  }
  0x33   :  { %828 = dma.done.wait [#allocation3], 256  }
  0x34   :  { %829 = vsyncadd [#allocation3], 4294967040 }
  0x35   :  { %830 = dma.done.wait [#allocation5], 6144  }
  0x36   :  { %831 = vsyncadd [#allocation5], 4294961152  ;;  %v839_v0 = vmov 0   ;;  %v691_v1 = vld [vmem:[#allocation2 + $0x4] ss:$8 sps:$4 sm:$0xff]   ;;  %vm100_vm0 = vcmask 130048   ;;  %v80_v49 = vlaneseq }
  0x37   :  { %136 = vmatprep.mubr.bf16.mxu0 %v839_v0  ;;  %v693_v2 = vld [vmem:[#allocation2] ss:$8 sps:$4 sm:$0xff]   ;;  %104 = vmatprep.subr.bf16.mxu0 %v691_v1  ;;  %v694_v5 = vld [vmem:[#allocation4 + $0x4] ss:$8 sps:$4 sm:$0xff]   ;;  %v696_v6 = vld [vmem:[#allocation4] ss:$8 sps:$4 sm:$0xff]  }
  0x38   :  { %v74_v3 = vld [vmem:[%s954_s0] sm:$0xff]  ;;  %105 = vmatpush1.bf16.msra.mxu0 %v693_v2  ;;  %353 = vmatprep.subr.bf16.mxu1 %v694_v5  ;;  %v700_v9 = vld [vmem:[#allocation4 + $0x24] ss:$8 sps:$4 sm:$0xff]   ;;  %v702_v10 = vld [vmem:[#allocation4 + $0x20] ss:$8 sps:$4 sm:$0xff]   ;;  %v81_v50 = vshrl.u32 %v80_v49, 7 }
  0x39   :  { %v75_v4 = vpack.c.bf16 %v74_v3, %v74_v3  ;;  %v697_v7 = vld [vmem:[#allocation4 + $0x14] ss:$8 sps:$4 sm:$0xff]   ;;  %354 = vmatpush1.bf16.msra.mxu1 %v696_v6  ;;  %v699_v8 = vld [vmem:[#allocation4 + $0x10] ss:$8 sps:$4 sm:$0xff]   ;;  %v706_v13 = vld [vmem:[#allocation4 + $0x44] ss:$8 sps:$4 sm:$0xff]  }
  0x3a   :  { %355 = vmatprep.subr.bf16.mxu1 %v697_v7  ;;  %v703_v11 = vld [vmem:[#allocation4 + $0x34] ss:$8 sps:$4 sm:$0xff]   ;;  %v705_v12 = vld [vmem:[#allocation4 + $0x30] ss:$8 sps:$4 sm:$0xff]   ;;  %v708_v14 = vld [vmem:[#allocation4 + $0x40] ss:$8 sps:$4 sm:$0xff]  }
  0x3b   :  { %609 = vmatmul.mubr.msk.bf16.vlgmr.msra.gmra.mrb[0].mxu0 %vm100_vm0, %v75_v4  ;;  %v709_v15 = vld [vmem:[#allocation4 + $0x54] ss:$8 sps:$4 sm:$0xff]   ;;  %v711_v16 = vld [vmem:[#allocation4 + $0x50] ss:$8 sps:$4 sm:$0xff]   ;;  %v712_v17 = vld [vmem:[#allocation4 + $0x64] ss:$8 sps:$4 sm:$0xff]  }
  0x3c   :  { %v714_v18 = vld [vmem:[#allocation4 + $0x60] ss:$8 sps:$4 sm:$0xff]   ;;  %v715_v19 = vld [vmem:[#allocation4 + $0x74] ss:$8 sps:$4 sm:$0xff]   ;;  %v717_v20 = vld [vmem:[#allocation4 + $0x70] ss:$8 sps:$4 sm:$0xff]  }
  0x3d   :  { %356 = vmatpush1.bf16.msra.mxu1 %v699_v8  ;;  %v718_v21 = vld [vmem:[#allocation4 + $0x84] ss:$8 sps:$4 sm:$0xff]   ;;  %v720_v22 = vld [vmem:[#allocation4 + $0x80] ss:$8 sps:$4 sm:$0xff]   ;;  %v721_v23 = vld [vmem:[#allocation4 + $0x94] ss:$8 sps:$4 sm:$0xff]  }
  0x3e   :  { %357 = vmatprep.subr.bf16.mxu1 %v700_v9  ;;  %v723_v24 = vld [vmem:[#allocation4 + $0x90] ss:$8 sps:$4 sm:$0xff]   ;;  %v724_v25 = vld [vmem:[#allocation4 + $0xa4] ss:$8 sps:$4 sm:$0xff]   ;;  %v726_v26 = vld [vmem:[#allocation4 + $0xa0] ss:$8 sps:$4 sm:$0xff]  }
  0x3f   :  { %v727_v27 = vld [vmem:[#allocation4 + $0xb4] ss:$8 sps:$4 sm:$0xff]   ;;  %v729_v28 = vld [vmem:[#allocation4 + $0xb0] ss:$8 sps:$4 sm:$0xff]   ;;  %v730_v29 = vld [vmem:[#allocation4 + $0xc4] ss:$8 sps:$4 sm:$0xff]  }
  0x40   :  { %v732_v30 = vld [vmem:[#allocation4 + $0xc0] ss:$8 sps:$4 sm:$0xff]   ;;  %v733_v31 = vld [vmem:[#allocation4 + $0xd4] ss:$8 sps:$4 sm:$0xff]   ;;  %v735_v32 = vld [vmem:[#allocation4 + $0xd0] ss:$8 sps:$4 sm:$0xff]  }
  0x41   :  { %358 = vmatpush1.bf16.msra.mxu1 %v702_v10  ;;  %v736_v33 = vld [vmem:[#allocation4 + $0xe4] ss:$8 sps:$4 sm:$0xff]   ;;  %v738_v34 = vld [vmem:[#allocation4 + $0xe0] ss:$8 sps:$4 sm:$0xff]   ;;  %v739_v35 = vld [vmem:[#allocation4 + $0xf4] ss:$8 sps:$4 sm:$0xff]  }
  0x42   :  { %359 = vmatprep.subr.bf16.mxu1 %v703_v11  ;;  %v741_v36 = vld [vmem:[#allocation4 + $0xf0] ss:$8 sps:$4 sm:$0xff]   ;;  %v742_v37 = vld [vmem:[#allocation6 + $0x40] sm:$0xff]   ;;  %v744_v39 = vld [vmem:[#allocation6 + $0x48] sm:$0xff]   ;;  %v82_v51 = vsub.s32 0, %v81_v50  ;;  %v86_v53 = vsub.s32 1, %v81_v50 }
  0x43   :  { %v743_v38 = vld [vmem:[#allocation6] sm:$0xff]   ;;  %661 = vmatprep.subr.bf16.mxu0 %v742_v37  ;;  %v745_v40 = vld [vmem:[#allocation6 + $0x8] sm:$0xff]   ;;  %v746_v41 = vld [vmem:[#allocation6 + $0x50] sm:$0xff]  }
  0x44   :  { %662 = vmatpush3.bf16.msra.mxu0 %v743_v38  ;;  %v747_v42 = vld [vmem:[#allocation6 + $0x10] sm:$0xff]   ;;  %v748_v43 = vld [vmem:[#allocation6 + $0x58] sm:$0xff]   ;;  %v750_v45 = vld [vmem:[#allocation6 + $0x60] sm:$0xff]  }
  0x45   :  { %360 = vmatpush1.bf16.msra.mxu1 %v705_v12  ;;  %663 = vmatprep.subr.bf16.mxu0 %v744_v39  ;;  %v749_v44 = vld [vmem:[#allocation6 + $0x18] sm:$0xff]   ;;  %v751_v46 = vld [vmem:[#allocation6 + $0x20] sm:$0xff]   ;;  %v752_v47 = vld [vmem:[#allocation6 + $0x68] sm:$0xff]  }
  0x46   :  { %361 = vmatprep.subr.bf16.mxu1 %v706_v13  ;;  %v753_v48 = vld [vmem:[#allocation6 + $0x28] sm:$0xff]   ;;  %v78_v52 = vld [vmem:[%s956_s2] sm:$0x3]  ;;  %v756_v4 = vld [vmem:[#allocation6 + $0x78] sm:$0xff]  }
  0x47   :  { %v83_v54 = vrot.slane %v78_v52, %v82_v51  ;;  %v87_v55 = vrot.slane %v78_v52, %v86_v53  ;;  %v754_v2 = vld [vmem:[#allocation6 + $0x70] sm:$0xff]   ;;  %v757_v5 = vld [vmem:[#allocation6 + $0x38] sm:$0xff]  }
  0x48   :  { %664 = vmatpush3.bf16.msra.mxu0 %v745_v40  ;;  %v755_v3 = vld [vmem:[#allocation6 + $0x30] sm:$0xff]  }
  0x49   :  { %362 = vmatpush1.bf16.msra.mxu1 %v708_v14  ;;  %665 = vmatprep.subr.bf16.mxu0 %v746_v41  ;;  %v181_v6 = vld [vmem:[%s958_s4] sm:$0x3] }
  0x4a   :  { %363 = vmatprep.subr.bf16.mxu1 %v709_v15  ;;  %v186_v7 = vrot.slane %v181_v6, %v82_v51  ;;  %v190_v8 = vrot.slane %v181_v6, %v86_v53 }
  0x4c   :  { %666 = vmatpush3.bf16.msra.mxu0 %v747_v42 }
  0x4d   :  { %364 = vmatpush1.bf16.msra.mxu1 %v711_v16  ;;  %667 = vmatprep.subr.bf16.mxu0 %v748_v43 }
  0x4e   :  { %365 = vmatprep.subr.bf16.mxu1 %v712_v17 }
  0x50   :  { %668 = vmatpush3.bf16.msra.mxu0 %v749_v44 }
  0x51   :  { %366 = vmatpush1.bf16.msra.mxu1 %v714_v18  ;;  %669 = vmatprep.subr.bf16.mxu0 %v750_v45 }
  0x52   :  { %367 = vmatprep.subr.bf16.mxu1 %v715_v19 }
  0x54   :  { %670 = vmatpush3.bf16.msra.mxu0 %v751_v46 }
  0x55   :  { %368 = vmatpush1.bf16.msra.mxu1 %v717_v20  ;;  %671 = vmatprep.subr.bf16.mxu0 %v752_v47  ;;  %v642_v20 = vld [vmem:[%s960_s6] ss:$0 sm:$0xff] }
  0x56   :  { %369 = vmatprep.subr.bf16.mxu1 %v718_v21 }
  0x58   :  { %672 = vmatpush3.bf16.msra.mxu0 %v753_v48 }
  0x59   :  { %370 = vmatpush1.bf16.msra.mxu1 %v720_v22  ;;  %673 = vmatprep.subr.bf16.mxu0 %v754_v2 }
  0x5a   :  { %371 = vmatprep.subr.bf16.mxu1 %v721_v23 }
  0x5c   :  { %674 = vmatpush3.bf16.msra.mxu0 %v755_v3 }
  0x5d   :  { %372 = vmatpush1.bf16.msra.mxu1 %v723_v24  ;;  %675 = vmatprep.subr.bf16.mxu0 %v756_v4 }
  0x5e   :  { %373 = vmatprep.subr.bf16.mxu1 %v724_v25  ;;  %v659_v25 = vld [vmem:[%s961_s7] ss:$0 sm:$0xff] }
  0x60   :  { %676 = vmatpush3.bf16.msra.mxu0 %v757_v5 }
  0x61   :  { %374 = vmatpush1.bf16.msra.mxu1 %v726_v26 }
  0x62   :  { %375 = vmatprep.subr.bf16.mxu1 %v727_v27 }
  0x65   :  { %376 = vmatpush1.bf16.msra.mxu1 %v729_v28 }
  0x66   :  { %377 = vmatprep.subr.bf16.mxu1 %v730_v29 }
  0x69   :  { %378 = vmatpush1.bf16.msra.mxu1 %v732_v30 }
  0x6a   :  { %379 = vmatprep.subr.bf16.mxu1 %v733_v31 }
  0x6d   :  { %380 = vmatpush1.bf16.msra.mxu1 %v735_v32 }
  0x6e   :  { %381 = vmatprep.subr.bf16.mxu1 %v736_v33  ;;  %v660_v33 = vld [vmem:[%s962_s8] ss:$0 sm:$0xff] }
  0x71   :  { %382 = vmatpush1.bf16.msra.mxu1 %v738_v34 }
  0x72   :  { %383 = vmatprep.subr.bf16.mxu1 %v739_v35 }
  0x75   :  { %384 = vmatpush1.bf16.msra.mxu1 %v741_v36 }
 0x10e   :  { %v138_v56 = vpop.f32.mrb[0].mxu0 }
 0x10f   :  { %v139_v57 = vadd.f32 %v138_v56, %v83_v54  ;;  %v140_v58 = vpop.f32.mrb[1].mxu0 }
 0x110   :  { %v141_v59 = vadd.f32 %v140_v58, %v87_v55  ;;  %v142_v60 = vpop.f32.mrb[2].mxu0 }
 0x111   :  { %v145_v61 = vmax.f32 %v139_v57, 0.0  ;;  %v143_v62 = vpop.f32.mrb[3].mxu0 }
 0x112   :  { %v146_v63 = vmax.f32 %v141_v59, 0.0 }
 0x113   :  { %v147_v1 = vpack.c.bf16 %v145_v61, %v145_v61 }
 0x114   :  { %v148_v0 = vpack.c.bf16 %v146_v63, %v146_v63 }
 0x116   :  { %385 = vmatprep.mubr.bf16.mxu1 %v148_v0 }
 0x117   :  { %386 = vmatmul.mubr.bf16.vlgmr.msra.gmra.mrb[0].mxu1 %v147_v1 }
 0x1ea   :  { %v387_v9 = vpop.f32.mrb[0].mxu1 }
 0x1eb   :  { %v388_v10 = vadd.f32 %v387_v9, %v186_v7  ;;  %v389_v11 = vpop.f32.mrb[1].mxu1 }
 0x1ec   :  { %v390_v12 = vadd.f32 %v389_v11, %v190_v8  ;;  %v391_v13 = vpop.f32.mrb[2].mxu1 }
 0x1ed   :  { %v394_v14 = vmax.f32 %v388_v10, 0.0  ;;  %v392_v15 = vpop.f32.mrb[3].mxu1 }
 0x1ee   :  { %v395_v16 = vmax.f32 %v390_v12, 0.0 }
 0x1ef   :  { %v396_v18 = vpack.c.bf16 %v394_v14, %v394_v14 }
 0x1f0   :  { %v397_v17 = vpack.c.bf16 %v395_v16, %v395_v16 }
 0x1f2   :  { %565 = vmatprep.mubr.bf16.mxu0 %v397_v17 }
 0x1f3   :  { %566 = vmatmul.mubr.bf16.vlgmr.msra.gmra.mrb[4].mxu0 %v396_v18 }
 0x2c6   :  { %v677_v19 = vpop.f32.mrb[4].mxu0 }
 0x2c7   :  { %v678_v21 = vpop.f32.mrb[5].mxu0 }
 0x2c8   :  { %v679_v22 = vadd.f32 %v678_v21, %v677_v19  ;;  %v680_v23 = vpop.f32.mrb[6].mxu0 }
 0x2c9   :  { %v681_v24 = vpop.f32.mrb[7].mxu0 }
 0x2ca   :  { %v568_v26 = vadd.f32 %v679_v22, %v642_v20 }
 0x2cc   :  { %v580_v27 = vadd.f32 %v659_v25, %v568_v26  ;;  %v598_v35 = vmul.f32 %v660_v33, %v568_v26 }
 0x2ce   :  { %581 = vmax.xlane.f32.xlu0 %v580_v27 }
 0x35b   :  { %v582_v28 = vpop.xlane.xlu0 %581 }
 0x35c   :  { %v583_v29 = vsub.f32 %v580_v27, %v582_v28 }
 0x35e   :  { %v584_v30 = vmul.f32 1.442695, %v583_v29 }
 0x360   :  { %758 = vpow2.f32 %v584_v30 }
 0x36a   :  { %v759_v31 = vpop.eup %758 }
 0x36b   :  { %586 = vadd.xlane.f32.xlu0 %v759_v31 }
 0x3f8   :  { %v587_v32 = vpop.xlane.xlu0 %586 }
 0x3f9   :  { %760 = vrcp.f32 %v587_v32 }
 0x403   :  { %v761_v34 = vpop.eup %760 }
 0x404   :  { %v590_v36 = vmul.f32 %v761_v34, %v759_v31 }
 0x406   :  { %v599_v37 = vadd.f32 %v598_v35, %v590_v36 }
 0x408   :  { %600 = vst [vmem:[%s963_s9] sm:$0xff] %v599_v37 }
 0x409   :  { %605 = vsyncpa [#allocation3], 1 }
 0x40a   :  { %606 = vsyncpa [#allocation5], 1 }

</bundles_post_ra>
